<compile_context>
chip_gen: v7x
topology: tpu7x:2x2x1
jax: 0.10.0
libtpu: 0.0.40
codegen_flags: <defaults>
</compile_context>

<pallas_src>
import functools

import jax
import jax.numpy as jnp
import numpy as np
from jax.experimental import pallas as pl
from jax.experimental.pallas import tpu as pltpu

# Per-grid-step VMEM budget for (x block + out block + pe block). Pallas
# double-buffers each operand, so the pipelined working set is ~2x this:
# ~12 MiB, safe on every generation (v5e 16 MiB default scoped, v7x 64 MiB
# physical).
_BLOCK_BYTES_BUDGET = 6 * 1024 * 1024
# Explicit scoped-VMEM ceiling with headroom (raises v5e's 16 MiB default,
# matches v6e/v7x defaults, stays well under v7x's 64 MiB physical VMEM).
_VMEM_LIMIT_BYTES = 32 * 1024 * 1024
_LANE_WIDTH = 128  # below this, fold batch into lanes for a lane-dense layout


def _choose_tseq(seq: int, bytes_per_row: int) -> int:
    """Largest seq-tile whose (x + out + pe) block fits the per-step budget."""
    tseq = max(8, _BLOCK_BYTES_BUDGET // max(bytes_per_row, 1))
    return min(int(tseq), seq)


def _add_pe_kernel_3d(x_ref, pe_ref, o_ref):
    # x_ref/o_ref: (tseq, batch, d_model); pe_ref: (tseq, 1, d_model).
    # Size-1 batch dim broadcasts over sublanes in the add.
    o_ref[...] = (x_ref[...] + pe_ref[...]).astype(o_ref.dtype)


def _add_pe_kernel_folded(x_ref, pe_ref, o_ref, *, batch: int):
    # x_ref/o_ref: (tseq, batch*d_model) lane-dense; pe_ref: (tseq, 1, d_model).
    tseq = pe_ref.shape[0]
    d_model = pe_ref.shape[2]
    pe = pe_ref[...].reshape(tseq, d_model)        # drop the size-1 batch dim
    # Replicate pe across the folded batch positions along the lane dim.
    pe = jnp.concatenate([pe] * batch, axis=1)     # (tseq, batch*d_model)
    o_ref[...] = (x_ref[...] + pe).astype(o_ref.dtype)


def add_learned_pe(x: jax.Array, pe: jax.Array, *, tseq: int | None = None) -> jax.Array:
    """x + pe[:seq] (broadcast over batch) as a seq-tiled, pipelined Pallas kernel.

    x : (seq, batch, d_model); pe: (max_len, 1, d_model), max_len >= seq.
    """
    seq, batch, d_model = x.shape
    assert pe.shape[0] >= seq and pe.shape[1] == 1 and pe.shape[2] == d_model

    if pe.dtype != x.dtype:
        # Halves pe DMA bytes for bf16 activations and avoids a mixed-dtype store.
        pe = pe.astype(x.dtype)

    itemsize = jnp.dtype(x.dtype).itemsize
    bytes_per_row = (2 * batch + 1) * d_model * itemsize  # x + out + pe per seq row
    if tseq is None:
        tseq = _choose_tseq(seq, bytes_per_row)
    tseq = int(min(tseq, seq))
    if tseq < seq:
        tseq = max(8, (tseq // 8) * 8)  # sublane-aligned tiles when gridded
    grid = (pl.cdiv(seq, tseq),)

    cost = pl.CostEstimate(
        flops=seq * batch * d_model,
        transcendentals=0,
        bytes_accessed=2 * x.size * itemsize + seq * d_model * itemsize,
    )
    cparams = pltpu.CompilerParams(
        dimension_semantics=("parallel",),        # shards the seq grid on v7x's 2 TCs
        vmem_limit_bytes=_VMEM_LIMIT_BYTES,
    )
    # pe is windowed to rows [i*tseq, (i+1)*tseq) directly by its BlockSpec —
    # no XLA slice of the (max_len, 1, d_model) parameter.
    pe_spec = pl.BlockSpec((tseq, 1, d_model), lambda i: (i, 0, 0))

    fold = d_model < _LANE_WIDTH and batch > 1
    if fold:
        # Lane-dense path for small d_model: fold batch into the lane dim of
        # x/out (pe stays un-replicated in HBM; replication happens in VMEM).
        x_folded = x.reshape(seq, batch * d_model)
        xo_spec = pl.BlockSpec((tseq, batch * d_model), lambda i: (i, 0))
        out = pl.pallas_call(
            functools.partial(_add_pe_kernel_folded, batch=batch),
            out_shape=jax.ShapeDtypeStruct((seq, batch * d_model), x.dtype),
            grid=grid,
            in_specs=[xo_spec, pe_spec],
            out_specs=xo_spec,
            input_output_aliases={0: 0},
            compiler_params=cparams,
            cost_estimate=cost,
        )(x_folded, pe)
        return out.reshape(seq, batch, d_model)

    xo_spec = pl.BlockSpec((tseq, batch, d_model), lambda i: (i, 0, 0))
    return pl.pallas_call(
        _add_pe_kernel_3d,
        out_shape=jax.ShapeDtypeStruct((seq, batch, d_model), x.dtype),
        grid=grid,
        in_specs=[xo_spec, pe_spec],
        out_specs=xo_spec,
        input_output_aliases={0: 0},
        compiler_params=cparams,
        cost_estimate=cost,
    )(x, pe)


class PositionEmbeddingLearned1D:
    """JAX/Pallas port of the PyTorch PositionEmbeddingLearned1D module."""

    def __init__(self, d_model: int, max_len: int = 500, batch_first: bool = False,
                 *, key: jax.Array | None = None):
        self.batch_first = batch_first
        if key is None:
            key = jax.random.PRNGKey(0)
        # nn.Parameter(torch.zeros(max_len, 1, d_model)); nn.init.uniform_ -> U[0, 1)
        self.pe = jax.random.uniform(
            key, (max_len, 1, d_model), dtype=jnp.float32, minval=0.0, maxval=1.0
        )

    def __call__(self, x: jax.Array) -> jax.Array:
        if self.batch_first:
            # The PyTorch forward computes `pos` but returns x unchanged in this
            # branch; behaviour preserved exactly (no-op).
            return x
        return add_learned_pe(x, self.pe)


if __name__ == "__main__":
    root = jax.random.PRNGKey(0)
    k_param, k_x1, k_x2, k_x3 = jax.random.split(root, 4)

    # Case 1: small lane-sparse shape (d_model=32) -> folded lane-dense path.
    d_model, max_len, seq, batch = 32, 500, 8, 2
    mod = PositionEmbeddingLearned1D(d_model, max_len=max_len, batch_first=False, key=k_param)
    x = jax.random.normal(k_x1, (seq, batch, d_model), dtype=jnp.float32)
    out = jax.block_until_ready(mod(x))
    assert out.shape == (seq, batch, d_model)
    ref = np.asarray(x) + np.asarray(mod.pe)[:seq]
    np.testing.assert_allclose(np.asarray(out), ref, atol=1e-6, rtol=1e-6)

    # Case 2: lane-dense d_model (3-D path) with a forced multi-step seq grid
    # (tseq=8 -> grid=(4,)) to exercise the pipelined path.
    d2, seq2, batch2 = 128, 32, 2
    mod2 = PositionEmbeddingLearned1D(d2, max_len=max_len, batch_first=False, key=k_param)
    x2 = jax.random.normal(k_x2, (seq2, batch2, d2), dtype=jnp.float32)
    out2 = jax.block_until_ready(add_learned_pe(x2, mod2.pe, tseq=8))
    ref2 = np.asarray(x2) + np.asarray(mod2.pe)[:seq2]
    np.testing.assert_allclose(np.asarray(out2), ref2, atol=1e-6, rtol=1e-6)

    # Case 3: bf16 activations -> pe cast to bf16 in the wrapper, bf16 store.
    x3 = jax.random.normal(k_x3, (seq2, batch2, d2), dtype=jnp.bfloat16)
    out3 = jax.block_until_ready(add_learned_pe(x3, mod2.pe))
    pe_b16 = np.asarray(mod2.pe).astype(jnp.bfloat16).astype(np.float32)[:seq2]
    ref3 = np.asarray(x3).astype(np.float32) + pe_b16
    np.testing.assert_allclose(np.asarray(out3).astype(np.float32), ref3, atol=3e-2, rtol=0)

    # Case 4: batch_first=True branch is a faithful no-op (PyTorch quirk).
    mod_bf = PositionEmbeddingLearned1D(d_model, max_len=max_len, batch_first=True, key=k_param)
    x_bf = jnp.transpose(x, (1, 0, 2))  # (batch, seq, d_model)
    out_bf = jax.block_until_ready(mod_bf(x_bf))
    np.testing.assert_allclose(np.asarray(out_bf), np.asarray(x_bf))

    print("KERNEL_OK")
</pallas_src>

<mosaic_0001>
module attributes {stable_mosaic.version = 11 : i64} {
  func.func @_add_pe_kernel_folded(%arg0: i32, %arg1: memref<8x64xf32, #tpu.memory_space<vmem>>, %arg2: memref<8x1x32xf32, #tpu.memory_space<vmem>>, %arg3: memref<8x64xf32, #tpu.memory_space<vmem>>) attributes {dimension_semantics = [#tpu.dimension_semantics<parallel>], iteration_bounds = array<i64: 1>, scalar_prefetch = 0 : i64, scratch_operands = 0 : i64, tpu.core_type = #tpu.core_type<tc>, window_params = [{transform_indices = @transform_0, window_bounds = array<i64: 8, 64>}, {transform_indices = @transform_1, window_bounds = array<i64: 8, 1, 32>}, {transform_indices = @transform_2, window_bounds = array<i64: 8, 64>}]} {
    %c0 = arith.constant 0 : index
    %c0_0 = arith.constant 0 : index
    %c0_1 = arith.constant 0 : index
    %0 = vector.load %arg2[%c0, %c0_0, %c0_1] : memref<8x1x32xf32, #tpu.memory_space<vmem>>, vector<8x1x32xf32>
    %1 = vector.shape_cast %0 : vector<8x1x32xf32> to vector<8x32xf32>
    %2 = tpu.concatenate %1, %1 in 1 : vector<8x32xf32>, vector<8x32xf32> -> vector<8x64xf32>
    %c0_2 = arith.constant 0 : index
    %c0_3 = arith.constant 0 : index
    %3 = vector.load %arg1[%c0_2, %c0_3] : memref<8x64xf32, #tpu.memory_space<vmem>>, vector<8x64xf32>
    %4 = arith.addf %3, %2 : vector<8x64xf32>
    %c0_4 = arith.constant 0 : index
    %c0_5 = arith.constant 0 : index
    %5 = vector.load %arg3[%c0_4, %c0_5] : memref<8x64xf32, #tpu.memory_space<vmem>>, vector<8x64xf32>
    tpu.vector_store %arg3[%c0_4, %c0_5], %4 {strides = array<i32>} : memref<8x64xf32, #tpu.memory_space<vmem>>, vector<8x64xf32>,
    return
  }
  func.func @transform_0(%arg0: i32) -> (i32, i32) {
    %c0_i32 = arith.constant 0 : i32
    %c0_i32_0 = arith.constant 0 : i32
    return %arg0, %c0_i32 : i32, i32
  }
  func.func @transform_1(%arg0: i32) -> (i32, i32, i32) {
    %c0_i32 = arith.constant 0 : i32
    %c0_i32_0 = arith.constant 0 : i32
    %c0_i32_1 = arith.constant 0 : i32
    return %arg0, %c0_i32, %c0_i32_0 : i32, i32, i32
  }
  func.func @transform_2(%arg0: i32) -> (i32, i32) {
    %c0_i32 = arith.constant 0 : i32
    %c0_i32_0 = arith.constant 0 : i32
    return %arg0, %c0_i32 : i32, i32
  }
}

</mosaic_0001>

<bundles_post_ra>
// kernel: tpu_custom_call.1
= control target key start
LH: loop header
LB: loop body
LE: loop exit
PB: predicated region body
PF: predicated region fallthrough
CT: control target
= control target key end

     0   :  { %7 = vsyncpa [#allocation3], 0  ;;  %s233_s0 = inlined_call_operand.hbm [shape: f32[8,64], index: 0, kind: input, shape index: {}, may-alias: {0,2}]   ;;  %s234_s1 = inlined_call_operand.vmem [shape: f32[500,1,32], index: 1, kind: input, shape index: {}]   ;;  %s235_s2 = inlined_call_operand.hbm [shape: f32[8,64], index: 2, kind: output, shape index: {}, may-alias: {0,2}]  }
   0x1   :  { %8 = vsyncpa [#allocation4], 0  ;;  %s166_s9 = smov [#allocation2]   ;;  %s118_s13 = scalar_lea.hbm %s233_s0, 128 }
   0x2   :  { %s15_s10 = sshll.u32 %s166_s9, 4  ;;  %p119_p0 = scmp.ne.s32.totalorder %s233_s0, %s118_s13  ;;  %s16_s10 = int_to_ptr.vmem [resolvable:$true] %s15_s10 }
   0x3   :  { %p122_p1 = scmp.lt.u32.totalorder %s118_s13, %s233_s0 }
   0x5   :  { %p124_p2 = pnand %p122_p1, %p119_p0 }
   0x7   :  { %127 = shalt.err (!%p124_p2)
}
   0x8   :  { %s128_s18 = scalar_lea.vmem %s16_s10, 128  ;;  %p133_p4 = scmp.lt.s32.totalorder %s16_s10, %s16_s10 }
   0x9   :  { %p129_p3 = scmp.ne.s32.totalorder %s16_s10, %s128_s18  ;;  %p134_p5 = scmp.lt.s32.totalorder %s128_s18, %s128_s18 }
   0xb   :  { %p135_p6 = por %p134_p5, %p133_p4 }
   0xd   :  { %p136_p7 = pnand %p135_p6, %p129_p3 }
   0xf   :  { %139 = shalt.err (!%p136_p7)
}
  0x10   :  { %18 = dma.hbm_to_vmem [thread:$0]  %s233_s0, 128, %s16_s10, [#allocation3]  }
  0x11   :  { %162 = dma.done.wait [#allocation3], 128  }
  0x12   :  { %163 = vsyncadd [#allocation3], 4294967168  ;;  %v47_v0 = vlaneseq  ;;  %v167_v1 = vmov 1966171168   ;;  %v24_v6 = vld [vmem:[%s234_s1] sm:$0x1] }
  0x13   :  { %v45_v2 = vunpack.c.l.s4 %v167_v1  ;;  %v25_v7 = vld [vmem:[%s234_s1 + $0x1] sm:$0x1]  ;;  %v26_v8 = vld [vmem:[%s234_s1 + $0x2] sm:$0x1]  ;;  %v27_v9 = vld [vmem:[%s234_s1 + $0x3] sm:$0x1] }
  0x14   :  { %v48_v3 = vshrl.u32 %v47_v0, 7  ;;  %v28_v10 = vld [vmem:[%s234_s1 + $0x4] sm:$0x1]  ;;  %v29_v11 = vld [vmem:[%s234_s1 + $0x5] sm:$0x1]  ;;  %v40_v12 = vcombine.low %v24_v6, %v25_v7  ;;  %v41_v15 = vcombine.low %v26_v8, %v27_v9  ;;  %s168_s8 = smov 32  }
  0x15   :  { %v46_v4 = vunpack.c.0.s8 %v45_v2  ;;  %v30_v13 = vld [vmem:[%s234_s1 + $0x6] sm:$0x1]  ;;  %v31_v14 = vld [vmem:[%s234_s1 + $0x7] sm:$0x1]  ;;  %v42_v16 = vcombine.low %v28_v10, %v29_v11  ;;  %vm93_vm0 = vcmask 261120   ;;  %s169_s9 = smov [#allocation5]  }
  0x16   :  { %v43_v17 = vcombine.low %v30_v13, %v31_v14  ;;  %v95_v27 = vld [vmem:[#allocation2] sm:$0xff]  ;;  %s105_s10 = sshll.u32 %s169_s9, 4  ;;  %vm97_vm1 = vcmask 523264   ;;  %s106_s10 = int_to_ptr.vmem [resolvable:$true] %s105_s10 }
  0x17   :  { %v49_v5 = vsub.s32 %v46_v4, %v48_v3  ;;  %s140_s1 = scalar_lea.vmem %s106_s10, 128  ;;  %p145_p9 = scmp.lt.s32.totalorder %s106_s10, %s106_s10 }
  0x18   :  { %p141_p8 = scmp.ne.s32.totalorder %s106_s10, %s140_s1  ;;  %p146_p10 = scmp.lt.s32.totalorder %s140_s1, %s140_s1 }
  0x19   :  { %v50_v18 = vrot.slane %v40_v12, %v49_v5  ;;  %v57_v19 = vrot.slane %v41_v15, %v49_v5  ;;  %v64_v20 = vrot.slane %v42_v16, %v49_v5  ;;  %v71_v21 = vrot.slane %v43_v17, %v49_v5 }
  0x1a   :  { %p147_p11 = por %p146_p10, %p145_p9 }
  0x1b   :  { %v72_v22 = vcombine.low %v50_v18, %v57_v19  ;;  %v73_v23 = vcombine.low %v64_v20, %v71_v21 }
  0x1c   :  { %p148_p12 = pnand %p147_p11, %p141_p8 }
  0x1d   :  { %v80_v24 = vrot.slane %v72_v22, %v49_v5  ;;  %v87_v25 = vrot.slane %v73_v23, %v49_v5 }
  0x1f   :  { %v88_v26 = vcombine.low %v80_v24, %v87_v25 }
  0x21   :  { %90 = vrot.lane.b32.xlu0 %v88_v26, %s168_s8 }
  0x93   :  { %v91_v28 = vpop.permute.xlu0 %90 }
  0x94   :  { %v94_v29 = vsel %vm93_vm0, %v88_v26, %v91_v28 }
  0x95   :  { %v96_v30 = vadd.f32 %v95_v27, %v94_v29 }
  0x97   :  { %98 = vst.msk [vmem:[#allocation5] sm:$0xff] %vm97_vm1, %v96_v30 }
  0x98   :  { %151 = shalt.err (!%p148_p12)
}
  0x99   :  { %s152_s13 = scalar_lea.hbm %s235_s2, 128 }
  0x9a   :  { %p153_p13 = scmp.ne.s32.totalorder %s235_s2, %s152_s13  ;;  %p156_p0 = scmp.lt.u32.totalorder %s152_s13, %s235_s2 }
  0x9c   :  { %p158_p1 = pnand %p156_p0, %p153_p13 }
  0x9e   :  { %161 = shalt.err (!%p158_p1)
}
  0x9f   :  { %108 = dma.vmem_to_hbm [thread:$0]  %s106_s10, 128, %s235_s2, [#allocation4]  }
  0xa0   :  { %164 = dma.done.wait [#allocation4], 128  }
  0xa1   :  { %165 = vsyncadd [#allocation4], 4294967168 }
  0xa2   :  { %112 = vsyncpa [#allocation3], 1 }
  0xa3   :  { %113 = vsyncpa [#allocation4], 1 }

</bundles_post_ra>
